<compile_context>
chip_gen: v5e
topology: v5e:2x2
jax: 0.10.0
libtpu: 0.0.40
codegen_flags: <defaults>
</compile_context>

<pallas_src>
import jax
import jax.numpy as jnp
from jax.experimental import pallas as pl
from jax.experimental.pallas import tpu as pltpu


def _rope_kernel(x_ref, cos_ref, sin_even_ref, sin_odd_ref, out_ref):
    # x_ref/out_ref: (T, d_k); cos/sin tables: (T, d_k).
    x = x_ref[...]
    d = x.shape[-1]
    # Neighbour values via circular lane rotation (XLU):
    #   x_next[:, i] = x[:, (i + 1) % d]  -> consumed only at even lanes
    #   x_prev[:, i] = x[:, (i - 1) % d]  -> consumed only at odd lanes
    x_next = pltpu.roll(x, d - 1, axis=1)
    x_prev = pltpu.roll(x, 1, axis=1)
    out_ref[...] = (
        x * cos_ref[...] + x_next * sin_even_ref[...] + x_prev * sin_odd_ref[...]
    )


class RotaryPositionalEncoding:
    """Pallas-TPU port of the PyTorch RotaryPositionalEncoding module."""

    def __init__(self, d_k: int, max_seq_len: int, theta: float = 10000.0):
        assert d_k % 2 == 0
        self.d_k = d_k
        self.max_seq_len = max_seq_len
        self.theta = theta

        i = jnp.arange(d_k // 2, dtype=jnp.float32)
        theta_i = theta ** (-2.0 * i / d_k)                     # (d_k//2,)
        pos = jnp.arange(max_seq_len, dtype=jnp.float32)[:, None]
        angles = pos * theta_i                                  # (L, d_k//2)
        cos = jnp.cos(angles)
        sin = jnp.sin(angles)
        zeros = jnp.zeros_like(sin)
        # Interleaved kernel tables, shape (L, d_k):
        #   cos_dup  = [ c0, c0,  c1, c1, ...]
        #   sin_even = [-s0,  0, -s1,  0, ...]   (multiplies x[i+1])
        #   sin_odd  = [  0, s0,   0, s1, ...]   (multiplies x[i-1])
        self.cos_dup = jnp.repeat(cos, 2, axis=-1)
        self.sin_even = jnp.stack([-sin, zeros], axis=-1).reshape(max_seq_len, d_k)
        self.sin_odd = jnp.stack([zeros, sin], axis=-1).reshape(max_seq_len, d_k)
        # Same buffer layout PyTorch registers as `rope_cache` (used by the reference).
        self.rope_cache = jnp.stack([cos, sin], axis=-1)        # (L, d_k//2, 2)

    def __call__(self, x: jax.Array, token_positions=None) -> jax.Array:
        # token_positions is accepted but unused, exactly like the reference forward.
        del token_positions
        orig_shape = x.shape
        S, D = orig_shape[-2], orig_shape[-1]
        assert D == self.d_k and S <= self.max_seq_len
        x3 = x.reshape(-1, S, D)
        B = x3.shape[0]

        cos_t = self.cos_dup[:S].astype(x.dtype)
        sin_e = self.sin_even[:S].astype(x.dtype)
        sin_o = self.sin_odd[:S].astype(x.dtype)

        # Token tile: full seq if small, else 256 rows (multiple of 8 sublanes).
        T = S if S <= 256 else 256
        grid = (pl.cdiv(S, T), B)   # batch fastest: table blocks stay resident.

        itemsize = jnp.dtype(x.dtype).itemsize
        out3 = pl.pallas_call(
            _rope_kernel,
            grid_spec=pltpu.PrefetchScalarGridSpec(
                num_scalar_prefetch=0,
                grid=grid,
                in_specs=[
                    pl.BlockSpec((None, T, D), lambda s, b: (b, s, 0)),
                    pl.BlockSpec((T, D), lambda s, b: (s, 0)),
                    pl.BlockSpec((T, D), lambda s, b: (s, 0)),
                    pl.BlockSpec((T, D), lambda s, b: (s, 0)),
                ],
                out_specs=pl.BlockSpec((None, T, D), lambda s, b: (b, s, 0)),
            ),
            out_shape=jax.ShapeDtypeStruct((B, S, D), x.dtype),
            compiler_params=pltpu.CompilerParams(
                dimension_semantics=("parallel", "parallel"),
            ),
            cost_estimate=pl.CostEstimate(
                flops=6 * B * S * D,
                transcendentals=0,
                bytes_accessed=(2 * B * S * D + 3 * S * D) * itemsize,
            ),
        )(x3, cos_t, sin_e, sin_o)

        return out3.reshape(orig_shape)


def rope_reference(rope: RotaryPositionalEncoding, x: jax.Array) -> jax.Array:
    """Pure-JAX mirror of the PyTorch complex-multiply forward."""
    orig_shape = x.shape
    S, D = orig_shape[-2], orig_shape[-1]
    xp = x.reshape(-1, S, D // 2, 2)
    xe, xo = xp[..., 0], xp[..., 1]
    cos = rope.rope_cache[:S, :, 0][None]
    sin = rope.rope_cache[:S, :, 1][None]
    oe = xe * cos - xo * sin
    oo = xe * sin + xo * cos
    return jnp.stack([oe, oo], axis=-1).reshape(orig_shape)


if __name__ == "__main__":
    d_k = 128
    max_seq_len = 32
    batch, heads, seq = 2, 4, 16

    key = jax.random.PRNGKey(0)
    x = jax.random.normal(key, (batch, heads, seq, d_k), dtype=jnp.float32)

    rope = RotaryPositionalEncoding(d_k=d_k, max_seq_len=max_seq_len)
    out = jax.block_until_ready(rope(x))

    ref = rope_reference(rope, x)
    assert out.shape == x.shape
    assert out.dtype == x.dtype
    max_err = float(jnp.max(jnp.abs(out - ref)))
    assert jnp.allclose(out, ref, atol=1e-5, rtol=1e-5), f"max_err={max_err}"

    print("KERNEL_OK")
</pallas_src>

<mosaic_0001>
module attributes {stable_mosaic.version = 11 : i64} {
  func.func @_rope_kernel(%arg0: i32, %arg1: i32, %arg2: memref<1x16x128xf32, #tpu.memory_space<vmem>>, %arg3: memref<16x128xf32, #tpu.memory_space<vmem>>, %arg4: memref<16x128xf32, #tpu.memory_space<vmem>>, %arg5: memref<16x128xf32, #tpu.memory_space<vmem>>, %arg6: memref<1x16x128xf32, #tpu.memory_space<vmem>>) attributes {dimension_semantics = [#tpu.dimension_semantics<parallel>, #tpu.dimension_semantics<parallel>], iteration_bounds = array<i64: 1, 8>, scalar_prefetch = 0 : i64, scratch_operands = 0 : i64, tpu.core_type = #tpu.core_type<tc>, window_params = [{transform_indices = @transform_0, window_bounds = array<i64: 1, 16, 128>}, {transform_indices = @transform_1, window_bounds = array<i64: 16, 128>}, {transform_indices = @transform_2, window_bounds = array<i64: 16, 128>}, {transform_indices = @transform_3, window_bounds = array<i64: 16, 128>}, {transform_indices = @transform_4, window_bounds = array<i64: 1, 16, 128>}]} {
    %c0 = arith.constant 0 : index
    %c0_0 = arith.constant 0 : index
    %c0_1 = arith.constant 0 : index
    %0 = vector.load %arg2[%c0, %c0_0, %c0_1] : memref<1x16x128xf32, #tpu.memory_space<vmem>>, vector<1x16x128xf32>
    %1 = vector.shape_cast %0 : vector<1x16x128xf32> to vector<16x128xf32>
    %c127_i32 = arith.constant 127 : i32
    %2 = tpu.dynamic_rotate %1 by %c127_i32 dim 1 : vector<16x128xf32>, i32 -> vector<16x128xf32>
    %c1_i32 = arith.constant 1 : i32
    %3 = tpu.dynamic_rotate %1 by %c1_i32 dim 1 : vector<16x128xf32>, i32 -> vector<16x128xf32>
    %c0_2 = arith.constant 0 : index
    %c0_3 = arith.constant 0 : index
    %4 = vector.load %arg3[%c0_2, %c0_3] : memref<16x128xf32, #tpu.memory_space<vmem>>, vector<16x128xf32>
    %5 = arith.mulf %1, %4 : vector<16x128xf32>
    %c0_4 = arith.constant 0 : index
    %c0_5 = arith.constant 0 : index
    %6 = vector.load %arg4[%c0_4, %c0_5] : memref<16x128xf32, #tpu.memory_space<vmem>>, vector<16x128xf32>
    %7 = arith.mulf %2, %6 : vector<16x128xf32>
    %8 = arith.addf %5, %7 : vector<16x128xf32>
    %c0_6 = arith.constant 0 : index
    %c0_7 = arith.constant 0 : index
    %9 = vector.load %arg5[%c0_6, %c0_7] : memref<16x128xf32, #tpu.memory_space<vmem>>, vector<16x128xf32>
    %10 = arith.mulf %3, %9 : vector<16x128xf32>
    %11 = arith.addf %8, %10 : vector<16x128xf32>
    %c0_8 = arith.constant 0 : index
    %c0_9 = arith.constant 0 : index
    %c0_10 = arith.constant 0 : index
    %12 = vector.load %arg6[%c0_8, %c0_9, %c0_10] : memref<1x16x128xf32, #tpu.memory_space<vmem>>, vector<1x16x128xf32>
    %13 = vector.shape_cast %12 : vector<1x16x128xf32> to vector<16x128xf32>
    %14 = vector.shape_cast %11 : vector<16x128xf32> to vector<1x16x128xf32>
    tpu.vector_store %arg6[%c0_8, %c0_9, %c0_10], %14 {strides = array<i32>} : memref<1x16x128xf32, #tpu.memory_space<vmem>>, vector<1x16x128xf32>,
    return
  }
  func.func @transform_0(%arg0: i32, %arg1: i32) -> (i32, i32, i32) {
    %c0_i32 = arith.constant 0 : i32
    %c0_i32_0 = arith.constant 0 : i32
    return %arg1, %arg0, %c0_i32 : i32, i32, i32
  }
  func.func @transform_1(%arg0: i32, %arg1: i32) -> (i32, i32) {
    %c0_i32 = arith.constant 0 : i32
    %c0_i32_0 = arith.constant 0 : i32
    return %arg0, %c0_i32 : i32, i32
  }
  func.func @transform_2(%arg0: i32, %arg1: i32) -> (i32, i32) {
    %c0_i32 = arith.constant 0 : i32
    %c0_i32_0 = arith.constant 0 : i32
    return %arg0, %c0_i32 : i32, i32
  }
  func.func @transform_3(%arg0: i32, %arg1: i32) -> (i32, i32) {
    %c0_i32 = arith.constant 0 : i32
    %c0_i32_0 = arith.constant 0 : i32
    return %arg0, %c0_i32 : i32, i32
  }
  func.func @transform_4(%arg0: i32, %arg1: i32) -> (i32, i32, i32) {
    %c0_i32 = arith.constant 0 : i32
    %c0_i32_0 = arith.constant 0 : i32
    return %arg1, %arg0, %c0_i32 : i32, i32, i32
  }
}

</mosaic_0001>

<bundles_post_ra>
// kernel: tpu_custom_call.1
= control target key start
LH: loop header
LB: loop body
LE: loop exit
PB: predicated region body
PF: predicated region fallthrough
CT: control target
= control target key end

     0   :  { %s1034_s0 = inlined_call_operand.hbm [shape: f32[8,16,128], index: 0, kind: input, shape index: {}]   ;;  %s1035_s1 = inlined_call_operand.hbm [shape: f32[16,128], index: 1, kind: input, shape index: {}]   ;;  %s1036_s2 = inlined_call_operand.hbm [shape: f32[16,128], index: 2, kind: input, shape index: {}]   ;;  %s1037_s3 = inlined_call_operand.hbm [shape: f32[16,128], index: 3, kind: input, shape index: {}]   ;;  %s1038_s4 = inlined_call_operand.hbm [shape: f32[8,16,128], index: 4, kind: output, shape index: {}]  }
   0x1   :  { %1041 = sst [smem:[#allocation15_spill]] %s1035_s1 }
   0x2   :  { %1042 = sst [smem:[#allocation16_spill]] %s1036_s2 }
   0x3   :  { %9 = vsyncpa [#allocation3], 0 }
   0x4   :  { %11 = vsyncpa [#allocation3 + $0x1], 0 }
   0x5   :  { %12 = vsyncpa [#allocation6], 0 }
   0x6   :  { %13 = vsyncpa [#allocation9], 0 }
   0x7   :  { %14 = vsyncpa [#allocation4], 0 }
   0x8   :  { %16 = vsyncpa [#allocation4 + $0x1], 0  ;;  %s851_s15 = smov 0   ;;  %s853_s16 = smov 0  }
   0x9   :  { %s855_s17 = smov 0   ;;  %s857_s18 = smov 0  }
   0xa   :  { %s859_s19 = smov 0   ;;  %s861_s20 = smov 0  }
   0xb LB: > { %s483_s21 = sadd.s32 4294967295, %s815_s20   ;;  %s484_s22 = sadd.s32 4294967294, %s815_s20   ;;  %s815_s20 = sphi %s861_s20, %s22_s20   ;;  %s811_s19 = sphi %s859_s19, %s1059_s19   ;;  %s807_s18 = sphi %s857_s18, %s1058_s18   ;;  %s803_s17 = sphi %s855_s17, %s1057_s17   ;;  %s799_s16 = sphi %s853_s16, %s1056_s16   ;;  %s795_s15 = sphi %s851_s15, %s1055_s15  }
   0xc   : > { %p56_p0 = scmp.ne.s32.totalorder %s799_s16, %s795_s15  ;;  %p885_p1 = scmp.eq.s32.totalorder %s483_s21, 0 }
   0xd   : > { %p889_p2 = scmp.eq.s32.totalorder %s483_s21, 7  ;;  %p166_p3 = scmp.eq.s32.totalorder %s484_s22, 7 }
   0xe   : > { %p895_p4 = por %p885_p1, %p56_p0  ;;  %p485_p5 = scmp.ge.s32.totalorder %s815_s20, 1 }
   0xf   : > { %p900_p6 = por %p166_p3, %p56_p0  ;;  %p173_p7 = scmp.lt.s32.totalorder %s815_s20, 9 }
  0x10   : > { %s1047_s1 = sld [smem:[#allocation15_spill]]  ;;  %s817_s5 = smov [#allocation5]  }
  0x11   : > { %p908_p8 = pnand %p485_p5, %p173_p7  ;;  %s189_s6 = sshll.u32 %s817_s5, 4  ;;  %s190_s6 = int_to_ptr.vmem [resolvable:$true] %s189_s6 }
  0x12   : > { %s1050_s2 = sld [smem:[#allocation16_spill]]  ;;  %s1039_s11 = smov 128  }
  0x13   : > { %p522_p9 = pneg %p908_p8  ;;  %s1040_s12 = smov 8  }
  0x14   : > { %s820_s13 = smov [#allocation7]   ;;  %s221_s27 = sshll.u32 %s1037_s3, 4  ;;  %s222_s27 = int_to_ptr.hbm [resolvable:$true] %s221_s27 }
  0x15   : > { %p916_p10 = pnand %p522_p9, %p885_p1  ;;  %s206_s14 = sshll.u32 %s820_s13, 4  ;;  %s207_s14 = int_to_ptr.vmem [resolvable:$true] %s206_s14 }
  0x16   : > { %s187_s29 = sshll.u32 %s1047_s1, 4  ;;  %s821_s28 = smov [#allocation8]   ;;  %s188_s29 = int_to_ptr.hbm [resolvable:$true] %s187_s29 }
  0x17   : > { %525 = dma.hbm_to_vmem [thread:$0]  (!%p916_p10), %s188_s29, 256, %s190_s6, [#allocation6], %s1039_s11, %s1039_s11, %s1040_s12  }
  0x18   : > { %s204_s10 = sshll.u32 %s1050_s2, 4  ;;  %s223_s5 = sshll.u32 %s821_s28, 4  ;;  %s205_s10 = int_to_ptr.hbm [resolvable:$true] %s204_s10  ;;  %s224_s5 = int_to_ptr.vmem [resolvable:$true] %s223_s5 }
  0x19   : > { %528 = dma.hbm_to_vmem [thread:$0]  (!%p916_p10), %s205_s10, 256, %s207_s14, [#allocation6], %s1039_s11, %s1039_s11, %s1040_s12  }
  0x1a   : > { %531 = dma.hbm_to_vmem [thread:$0]  (!%p916_p10), %s222_s27, 256, %s224_s5, [#allocation9], %s1039_s11, %s1039_s11, %s1040_s12  }
  0x1b   : > { %s31_s29 = sadd.s32 1, %s811_s19  ;;  %s43_s6 = sadd.s32 1, %s803_s17 }
  0x1c   : > { %p32_p11 = scmp.ge.s32.totalorder %s31_s29, 8  ;;  %p50_p12 = scmp.ne.s32.totalorder %s803_s17, %s799_s16 }
  0x1d   : > { %p51_p13 = scmp.eq.s32.totalorder %s815_s20, 0  ;;  %p543_p5 = scmp.lt.s32.totalorder %s815_s20, 8 }
  0x1e   : > { %s1061_s29 = smov (%p32_p11, %s31_s29), 0  ;;  %p954_p3 = por %p889_p2, %p50_p12 }
  0x1f   : > { %p948_p0 = por %p51_p13, %p50_p12  ;;  %s38_s9 = ssub.s32 %s811_s19, %s1061_s29 }
  0x20   : > { %p41_p7 = scmp.eq.s32.totalorder %s38_s9, 0  ;;  %s237_s10 = sand.u32 1, %s803_s17  }
  0x21   : > { %s490_s13 = sshll.u32 %s237_s10, 4  ;;  %s504_s21 = sshll.u32 %s811_s19, 4 }
  0x22   : > { %s963_s14 = scalar_select %p41_p7, %s803_s17, %s43_s6  }
  0x23   : > { %s248_s28 = scalar_lea.hbm %s1034_s0, %s504_s21  ;;  %s241_s5 = scalar_lea.vmem [#allocation2], %s490_s13 }
  0x24   : > { %s251_s11 = sshll.u32 %s241_s5, 4  ;;  %s249_s24 = sshll.u32 %s248_s28, 4  ;;  %s252_s11 = int_to_ptr.vmem [resolvable:$true] %s251_s11  ;;  %s250_s24 = int_to_ptr.hbm [resolvable:$true] %s249_s24 }
  0x25   : > { %p533_p2 = pnand %p543_p5, %p948_p0  ;;  %s238_s12 = scalar_lea.sflag [#allocation3], %s237_s10 }
  0x26   : > { %s1053_s1 = smov 8   ;;  %s1054_s2 = smov 128  }
  0x27   : > { %535 = dma.hbm_to_vmem [thread:$0]  (!%p533_p2), %s250_s24, 256, %s252_s11, %s238_s12, %s1054_s2, %s1054_s2, %s1053_s1  }
  0x28   : > { %263 = sbr.rel (%p908_p8) target bundleno = 184 (0xb8), region = 36  ;;  %s977_s6 = sand.u32 (!%p908_p8), 1, %s799_s16  }
  0x29   : > { %s494_s9 = sshll.u32 (!%p908_p8), %s977_s6, 4  ;;  %s266_s13 = scalar_lea.sflag (!%p908_p8), [#allocation3], %s977_s6 }
  0x2a   : > { %s269_s8 = scalar_lea.vmem (!%p908_p8), [#allocation2], %s494_s9 }
  0x2d   : > { %778 = dma.done.wait (%p895_p4), %s266_s13, 256  }
  0x2e   : > { %780 = vsyncadd (%p895_p4), %s266_s13, 4294967040 }
  0x2f   : > { %782 = dma.done.wait (%p885_p1), [#allocation6], 512  }
  0x30   : > { %784 = vsyncadd (%p885_p1), [#allocation6], 4294966784 }
  0x31   : > { %786 = dma.done.wait (%p885_p1), [#allocation9], 256  }
  0x32   : > { %788 = vsyncadd (%p885_p1), [#allocation9], 4294967040  ;;  %v315_v0 = vld [vmem:[%s269_s8] sm:$0xff]  ;;  %s822_s1 = smov 127   ;;  %s823_s2 = smov 1   ;;  %v316_v1 = vld [vmem:[%s269_s8 + $0x8] sm:$0xff] }
  0x33   : > { %317 = vrot.lane.b32.xlu0 %v315_v0, %s822_s1  ;;  %321 = vrot.lane.b32.xlu1 %v315_v0, %s823_s2  ;;  %v325_v2 = vld [vmem:[#allocation5] sm:$0xff]  ;;  %v329_v3 = vld [vmem:[#allocation7] sm:$0xff]  ;;  %s505_s23 = sshll.u32 %s807_s18, 4  ;;  %v326_v11 = vld [vmem:[#allocation5 + $0x8] sm:$0xff]  ;;  %s309_s12 = scalar_lea.vmem [#allocation10], %s494_s9 }
  0x34   : > { %v335_v4 = vld [vmem:[#allocation8] sm:$0xff]  ;;  %v327_v5 = vmul.f32 %v325_v2, %v315_v0  ;;  %v330_v13 = vld [vmem:[#allocation7 + $0x8] sm:$0xff]  ;;  %v336_v14 = vld [vmem:[#allocation8 + $0x8] sm:$0xff]  ;;  %s357_s11 = scalar_lea.hbm %s1038_s4, %s505_s23  ;;  %v328_v15 = vmul.f32 %v326_v11, %v316_v1  ;;  %s358_s10 = sshll.u32 %s309_s12, 4  ;;  %s359_s10 = int_to_ptr.vmem [resolvable:$true] %s358_s10 }
  0x35   : > { %s360_s18 = sshll.u32 %s357_s11, 4  ;;  %s344_s21 = scalar_lea.sflag [#allocation4], %s977_s6  ;;  %s361_s18 = int_to_ptr.hbm [resolvable:$true] %s360_s18 }
  0x36   : > { %s739_s22 = sshra.s32 %s361_s18, 4  ;;  %s745_s24 = scalar_lea.hbm %s1038_s4, 128  ;;  %s740_s22 = int_to_ptr.hbm [resolvable:$true] %s739_s22 }
  0x37   : > { %s741_s27 = scalar_lea.hbm %s740_s22, 16  ;;  %p746_p9 = scmp.lt.s32.totalorder %s740_s22, %s1038_s4 }
  0x38   : > { %p742_p1 = scmp.ne.s32.totalorder %s740_s22, %s741_s27  ;;  %p747_p10 = scmp.lt.s32.totalorder %s745_s24, %s741_s27 }
  0x3a   : > { %p743_p4 = pnand %p742_p1, %p954_p3  ;;  %p748_p11 = por %p747_p10, %p746_p9 }
  0x3b   : > { %319 = vrot.lane.b32.xlu0 %v316_v1, %s822_s1  ;;  %323 = vrot.lane.b32.xlu1 %v316_v1, %s823_s2 }
  0x3c   : > { %p744_p8 = pneg %p743_p4 }
  0x3e   : > { %p749_p12 = pnand %p748_p11, %p744_p8 }
  0xa5   : > { %v318_v6 = vpop.permute.xlu0 %317  ;;  %v322_v7 = vpop.permute.xlu1 %321 }
  0xa6   : > { %v331_v8 = vmul.f32 %v329_v3, %v318_v6  ;;  %v337_v9 = vmul.f32 %v335_v4, %v322_v7 }
  0xa8   : > { %v333_v10 = vadd.f32 %v331_v8, %v327_v5 }
  0xaa   : > { %v339_v12 = vadd.f32 %v337_v9, %v333_v10 }
  0xac   : > { %341 = vst [vmem:[%s309_s12] sm:$0xff] %v339_v12 }
  0xad   : > { %v320_v16 = vpop.permute.xlu0 %319  ;;  %v324_v17 = vpop.permute.xlu1 %323 }
  0xae   : > { %v332_v18 = vmul.f32 %v330_v13, %v320_v16  ;;  %v338_v19 = vmul.f32 %v336_v14, %v324_v17 }
  0xb0   : > { %v334_v20 = vadd.f32 %v332_v18, %v328_v15 }
  0xb2   : > { %v340_v21 = vadd.f32 %v338_v19, %v334_v20 }
  0xb4   : > { %342 = vst [vmem:[%s309_s12 + $0x8] sm:$0xff] %v340_v21 }
  0xb5   : > { %752 = shalt.err (!%p749_p12)
}
  0xb6   : > { %s824_s6 = smov 128   ;;  %s825_s8 = smov 8  }
  0xb7   : > { %520 = dma.vmem_to_hbm [thread:$0]  (%p954_p3), %s359_s10, 256, %s361_s18, %s344_s21, %s824_s6, %s824_s6, %s825_s8  }
  0xb8 PF: > { %p547_p13 = scmp.ge.s32.totalorder %s815_s20, 2  ;;  %s375_s1 = sand.u32 1, %s795_s15  }
  0xb9   : > { %s376_s2 = scalar_lea.sflag [#allocation4], %s375_s1 }
  0xba   : > { %p537_p0 = pnand %p547_p13, %p900_p6 }
  0xbc   : > { %p538_p5 = pneg %p537_p0 }
  0xbe   : > { %790 = dma.done.wait (%p538_p5), %s376_s2, 256  }
  0xbf   : > { %792 = vsyncadd (%p538_p5), %s376_s2, 4294967040  ;;  %s22_s20 = sadd.s32 1, %s815_s20   ;;  %s1055_s15 = smov %s799_s16 }
  0xc0   : > { %p19_p7 = scmp.ge.s32.totalorder %s22_s20, 10   ;;  %s1056_s16 = smov %s803_s17 }
  0xc1   : > { %s1057_s17 = smov %s963_s14  ;;  %s1058_s18 = smov %s811_s19 }
  0xc2   : > { %s1059_s19 = smov %s1061_s29  ;;  %21 = sbr.rel (!%p19_p7) target bundleno = 11 (0xb), region = 96 }
  0xc7   :  { %382 = vsyncpa [#allocation3], 1 }
  0xc8   :  { %384 = vsyncpa [#allocation3 + $0x1], 1 }
  0xc9   :  { %385 = vsyncpa [#allocation6], 1 }
  0xca   :  { %386 = vsyncpa [#allocation9], 1 }
  0xcb   :  { %387 = vsyncpa [#allocation4], 1 }
  0xcc   :  { %389 = vsyncpa [#allocation4 + $0x1], 1 }

</bundles_post_ra>
